<compile_context>
chip_gen: v6e
topology: v6e:2x2x1
jax: 0.10.0
libtpu: 0.0.40
codegen_flags: <defaults>
</compile_context>

<pallas_src>
import functools

import jax
import jax.numpy as jnp
from jax import lax
from jax.experimental import pallas as pl
from jax.experimental.pallas import tpu as pltpu

_MiB = 2 ** 20


# --------------------------------------------------------------------------
# Generation-aware sizing helpers
# --------------------------------------------------------------------------
def _vmem_capacity_bytes():
    """Physical VMEM per core; conservative 64 MiB (v7x-sized) fallback."""
    try:
        info = pltpu.get_tpu_info()
        for attr in ("vmem_capacity_bytes", "vmem_bytes", "vmem_size_bytes"):
            v = getattr(info, attr, None)
            if v:
                return int(v)
    except Exception:
        pass
    return 64 * _MiB


def _num_tensorcores():
    try:
        info = pltpu.get_tpu_info()
        for attr in ("num_cores", "core_count", "num_tensorcores",
                     "tensorcore_count"):
            v = getattr(info, attr, None)
            if v:
                return int(v)
    except Exception:
        pass
    return 1


def _device_kind():
    try:
        return jax.devices()[0].device_kind.lower()
    except Exception:
        return ""


def _budgets():
    cap = _vmem_capacity_bytes()
    if cap <= 64 * _MiB:
        # v7x-class: 64 MiB VMEM per TensorCore, 32 MiB scoped default.
        return dict(tile=8 * _MiB, resident=16 * _MiB, limit_cap=32 * _MiB)
    # 128 MiB parts (v5e / v6e): resident-y can be generous.
    return dict(tile=12 * _MiB, resident=48 * _MiB, limit_cap=100 * _MiB)


def _pick_lane_tile(Lp, cin, cout, n_in, in_bytes, out_bytes, tile_budget):
    """Largest lane tile that is a multiple of 128, divides Lp and keeps
    double-buffered input + output tiles inside the generation budget."""
    per_lane = 2 * (cin * n_in * in_bytes + cout * out_bytes)  # double-buffered
    cap = max(128, min(4096, tile_budget // max(per_lane, 1)))
    cap -= cap % 128
    t = cap
    while t >= 128:
        if Lp % t == 0:
            return int(t)
        t -= 128
    return 128


def _auto_cout_chunks(cin, cout):
    # Split Cout across TensorCores only when the 1x1 conv is plausibly
    # compute-bound; otherwise the duplicated x reads just add HBM traffic.
    if _num_tensorcores() >= 2 and min(cin, cout) >= 512 and cout % 16 == 0:
        return 2
    return 1


# --------------------------------------------------------------------------
# Kernel
# --------------------------------------------------------------------------
def _conv_bn_kernel(*refs, eps, inv_count, matmul_dtype, has_residual,
                    resident_y, has_pad, L, TL, BN, n_lt):
    it = iter(refs)
    x_ref = next(it)
    r_ref = next(it) if has_residual else None
    w_ref = next(it)
    b_ref = next(it)
    g_ref = next(it)
    be_ref = next(it)
    o_ref = next(it)
    ssum_ref = next(it)
    ssq_ref = next(it)
    scale_ref = next(it)
    shift_ref = next(it)
    y_ref = next(it) if resident_y else None

    # grid = (cout_chunk, phase, batch_block, L_tile); chunk index only enters
    # through the BlockSpecs, the body never needs it.
    p = pl.program_id(1)
    n = pl.program_id(2)
    l = pl.program_id(3)

    @pl.when(jnp.logical_and(p == 0, jnp.logical_and(n == 0, l == 0)))
    def _():
        ssum_ref[...] = jnp.zeros_like(ssum_ref)
        ssq_ref[...] = jnp.zeros_like(ssq_ref)

    w = w_ref[...]                     # (Cc, Cin) already in matmul_dtype
    b = b_ref[...]                     # (Cc, 1)  f32

    def compute_y(bb):
        if has_residual:
            xs = (x_ref[bb].astype(jnp.float32)
                  + r_ref[bb].astype(jnp.float32)).astype(matmul_dtype)
        else:
            xs = x_ref[bb].astype(matmul_dtype)        # no f32 round-trip
        y = jnp.dot(w, xs, preferred_element_type=jnp.float32)  # (Cc, TL)
        return jnp.maximum(y + b, 0.0)

    if has_pad:
        lane_idx = lax.broadcasted_iota(jnp.int32, (1, TL), 1) + l * TL
        valid = lane_idx < L
    else:
        valid = None

    def y_row(bb):
        return (n * BN + bb) * n_lt + l

    @pl.when(p == 0)
    def _():
        cc = ssum_ref.shape[0]
        s_acc = jnp.zeros((cc, 1), jnp.float32)
        q_acc = jnp.zeros((cc, 1), jnp.float32)
        for bb in range(BN):
            y = compute_y(bb)
            if y_ref is not None:
                y_ref[pl.ds(y_row(bb), 1)] = y.astype(y_ref.dtype)[None]
            ym = jnp.where(valid, y, 0.0) if valid is not None else y
            s_acc = s_acc + jnp.sum(ym, axis=1, keepdims=True)
            q_acc = q_acc + jnp.sum(ym * ym, axis=1, keepdims=True)
        ssum_ref[...] += s_acc
        ssq_ref[...] += q_acc

    @pl.when(jnp.logical_and(p == 1, jnp.logical_and(n == 0, l == 0)))
    def _():
        # Fold BN into a per-channel affine: out = y * scale + shift.
        mean = ssum_ref[...] * inv_count
        var = jnp.maximum(ssq_ref[...] * inv_count - mean * mean, 0.0)
        s = g_ref[...] * lax.rsqrt(var + eps)
        scale_ref[...] = s
        shift_ref[...] = be_ref[...] - mean * s

    @pl.when(p == 1)
    def _():
        sc = scale_ref[...]
        sh = shift_ref[...]
        for bb in range(BN):
            if y_ref is not None:
                y = y_ref[pl.ds(y_row(bb), 1)][0].astype(jnp.float32)
            else:
                y = compute_y(bb)                # recompute fallback
            # Unconditional full-block write (see output-index-trick note).
            o_ref[bb] = (y * sc + sh).astype(o_ref.dtype)


# --------------------------------------------------------------------------
# Wrapper
# --------------------------------------------------------------------------
def conv_block(x, w, b, gamma, beta, residual=None, eps=1e-5, *,
               force_recompute=False, cout_chunks=None):
    """x: (N, C_in, L). w: (C_out, C_in, 1). Returns (N, C_out, L)."""
    N, Cin, L = x.shape
    Cout = w.shape[0]
    has_residual = residual is not None
    n_in = 2 if has_residual else 1

    in_bytes = x.dtype.itemsize
    out_dtype = x.dtype
    out_bytes = jnp.dtype(out_dtype).itemsize
    budgets = _budgets()

    # --- lane padding: keep the L axis a dense multiple of 128 -------------
    Lp = ((L + 127) // 128) * 128
    has_pad = Lp != L
    if has_pad:
        pad = ((0, 0), (0, 0), (0, Lp - L))
        x = jnp.pad(x, pad)
        if has_residual:
            residual = jnp.pad(residual, pad)

    TL = _pick_lane_tile(Lp, Cin, Cout, n_in, in_bytes, out_bytes,
                         budgets["tile"])
    n_lt = Lp // TL

    # --- batch blocking: amortize per-step overhead when L is short --------
    BN = 1
    if n_lt == 1:
        per_b = 2 * TL * (Cin * n_in * in_bytes + Cout * out_bytes)
        cap = max(1, budgets["tile"] // max(per_b, 1))
        for d in range(int(min(N, cap, 16)), 0, -1):
            if N % d == 0:
                BN = d
                break
    Nb = N // BN

    # --- Cout chunking (dual-TensorCore parts) ------------------------------
    if cout_chunks is None:
        cout_chunks = _auto_cout_chunks(Cin, Cout)
    if Cout % cout_chunks != 0 or (cout_chunks > 1 and
                                   (Cout // cout_chunks) % 8 != 0):
        cout_chunks = 1
    Cc = Cout // cout_chunks

    # --- matmul precision ----------------------------------------------------
    kind = _device_kind()
    is_v5e = ("v5 lite" in kind) or ("v5e" in kind) or ("v5lite" in kind)
    bf16_thr = 128 if is_v5e else 256
    matmul_dtype = (jnp.bfloat16 if (Cin >= bf16_thr and Cout >= bf16_thr)
                    else jnp.float32)

    # --- strategy: VMEM-resident y vs recompute-from-x ----------------------
    resident_y, y_dtype = False, jnp.float32
    if not force_recompute:
        for cand in (jnp.float32, jnp.bfloat16):
            if N * Cc * Lp * jnp.dtype(cand).itemsize <= budgets["resident"]:
                resident_y, y_dtype = True, cand
                break
    # TODO(synk): a third strategy (write y to HBM once, re-read it aliased)
    # could cover compute-bound shapes whose y exceeds VMEM; not implemented.

    # Parameter reshapes are tiny (Cout-sized), not data-sized.
    w2 = w.reshape(Cout, Cin).astype(matmul_dtype)
    b2 = b.reshape(Cout, 1).astype(jnp.float32)
    g2 = gamma.reshape(Cout, 1).astype(jnp.float32)
    be2 = beta.reshape(Cout, 1).astype(jnp.float32)

    kernel = functools.partial(
        _conv_bn_kernel,
        eps=float(eps), inv_count=1.0 / float(N * L),
        matmul_dtype=matmul_dtype, has_residual=has_residual,
        resident_y=resident_y, has_pad=has_pad,
        L=L, TL=TL, BN=BN, n_lt=n_lt)

    data_block = (BN, Cin, TL)
    if resident_y:
        # Phase 1 never reads x: pin its block index to the LAST phase-0 block
        # so the pipeline issues zero input DMAs during the normalize pass.
        data_map = lambda c, p, n, l: (n * (1 - p) + (Nb - 1) * p, 0,
                                       l * (1 - p) + (n_lt - 1) * p)
    else:
        data_map = lambda c, p, n, l: (n, 0, l)

    stream_tile = BN * Cin * TL * in_bytes
    out_tile = BN * Cc * TL * out_bytes
    # Triple-buffer the streamed inputs only for long streams with tiny
    # per-step compute (small-channel, HBM/DMA-bound regime).
    use_triple = (Nb * n_lt >= 8 and Cin * Cout <= 16384
                  and 3 * n_in * stream_tile <= budgets["tile"])

    def _data_spec():
        if use_triple:
            return pl.BlockSpec(data_block, data_map,
                                pipeline_mode=pl.Buffered(3))
        return pl.BlockSpec(data_block, data_map)

    param_map = lambda c, p, n, l: (c, 0)

    in_specs = [_data_spec()]
    inputs = [x]
    if has_residual:
        in_specs.append(_data_spec())
        inputs.append(residual)
    in_specs += [
        pl.BlockSpec((Cc, Cin), param_map),
        pl.BlockSpec((Cc, 1), param_map),
        pl.BlockSpec((Cc, 1), param_map),
        pl.BlockSpec((Cc, 1), param_map),
    ]
    inputs += [w2, b2, g2, be2]

    # Output block index is pinned to (0, c, 0) through phase 0 (never written
    # there), so the first real writeback happens only after phase 1 fully
    # overwrites that block.  Phase-1 writes are unconditional full-block
    # writes.
    out_spec = pl.BlockSpec((BN, Cc, TL), lambda c, p, n, l: (n * p, c, l * p))

    scratch = [pltpu.VMEM((Cc, 1), jnp.float32)] * 4
    if resident_y:
        scratch = scratch + [pltpu.VMEM((N * n_lt, Cc, TL), y_dtype)]

    n_in_buf = 3 if use_triple else 2
    param_bytes = 2 * Cout * (Cin * jnp.dtype(matmul_dtype).itemsize + 3 * 4)
    resident_bytes = (N * n_lt * Cc * TL * jnp.dtype(y_dtype).itemsize
                      if resident_y else 0)
    vmem_limit = (n_in_buf * n_in * stream_tile + 2 * out_tile + param_bytes
                  + resident_bytes + 4 * _MiB)
    vmem_limit = int(min(max(vmem_limit, 32 * _MiB), budgets["limit_cap"]))

    out = pl.pallas_call(
        kernel,
        out_shape=jax.ShapeDtypeStruct((N, Cout, Lp), out_dtype),
        grid=(cout_chunks, 2, Nb, n_lt),
        in_specs=in_specs,
        out_specs=out_spec,
        scratch_shapes=scratch,
        compiler_params=pltpu.CompilerParams(
            dimension_semantics=("parallel", "arbitrary", "arbitrary",
                                 "arbitrary"),
            vmem_limit_bytes=vmem_limit),
    )(*inputs)

    if has_pad:
        out = out[:, :, :L]
    return out


def conv_block_ref(x, w, b, gamma, beta, residual=None, eps=1e-5):
    """Pure-JAX reference (mirrors the PyTorch ConvBlock in training mode)."""
    if residual is not None:
        x = x + residual
    w2 = w.reshape(w.shape[0], w.shape[1])
    y = jnp.einsum("oc,ncl->nol", w2, x) + b[None, :, None]
    y = jnp.maximum(y, 0.0)
    mean = jnp.mean(y, axis=(0, 2), keepdims=True)
    var = jnp.mean((y - mean) ** 2, axis=(0, 2), keepdims=True)
    y_hat = (y - mean) / jnp.sqrt(var + eps)
    return gamma[None, :, None] * y_hat + beta[None, :, None]


# TODO(synk): BatchNorm1d running_mean/running_var state update is training
# bookkeeping that does not affect the forward output; not implemented.


if __name__ == "__main__":
    key = jax.random.PRNGKey(0)
    k_x, k_r, k_w, k_b, k_g, k_be = jax.random.split(key, 6)

    N, Cin, Cout, L = 2, 4, 16, 16

    x = jax.random.normal(k_x, (N, Cin, L), dtype=jnp.float32)
    residual = jax.random.normal(k_r, (N, Cin, L), dtype=jnp.float32)

    # Conv1d(dim_in, dim_out, 1): weight (C_out, C_in, 1), bias (C_out,)
    w = jax.random.normal(k_w, (Cout, Cin, 1), dtype=jnp.float32) / Cin ** 0.5
    b = jax.random.normal(k_b, (Cout,), dtype=jnp.float32) * 0.1
    # Non-trivial BN affine (PyTorch default init is gamma=1, beta=0).
    gamma = 1.0 + 0.1 * jax.random.normal(k_g, (Cout,), dtype=jnp.float32)
    beta = 0.1 * jax.random.normal(k_be, (Cout,), dtype=jnp.float32)

    ref_res = conv_block_ref(x, w, b, gamma, beta, residual=residual)
    ref_plain = conv_block_ref(x, w, b, gamma, beta)

    # 1) residual + resident-y fast path (also exercises lane padding + mask)
    out = jax.block_until_ready(conv_block(x, w, b, gamma, beta,
                                           residual=residual))
    assert out.shape == (N, Cout, L)
    assert jnp.allclose(out, ref_res, atol=1e-4, rtol=1e-4), \
        "mismatch vs reference (residual, resident-y)"

    # 2) no-residual specialization (no synthetic zeros input)
    out2 = jax.block_until_ready(conv_block(x, w, b, gamma, beta))
    assert jnp.allclose(out2, ref_plain, atol=1e-4, rtol=1e-4), \
        "mismatch vs reference (no residual)"

    # 3) recompute fallback (path taken when y does not fit in VMEM)
    out3 = jax.block_until_ready(conv_block(x, w, b, gamma, beta,
                                            residual=residual,
                                            force_recompute=True))
    assert jnp.allclose(out3, ref_res, atol=1e-4, rtol=1e-4), \
        "mismatch vs reference (recompute)"

    # 4) Cout-chunked grid (dual-TensorCore / v7x layout), 2 chunks of 8
    out4 = jax.block_until_ready(conv_block(x, w, b, gamma, beta,
                                            residual=residual, cout_chunks=2))
    assert jnp.allclose(out4, ref_res, atol=1e-4, rtol=1e-4), \
        "mismatch vs reference (cout_chunks=2)"

    print("KERNEL_OK")
</pallas_src>

<mosaic_0001>
module attributes {stable_mosaic.version = 11 : i64} {
  func.func @_conv_bn_kernel(%arg0: i32, %arg1: i32, %arg2: i32, %arg3: i32, %arg4: memref<2x4x128xf32, #tpu.memory_space<vmem>>, %arg5: memref<2x4x128xf32, #tpu.memory_space<vmem>>, %arg6: memref<16x4xf32, #tpu.memory_space<vmem>>, %arg7: memref<16x1xf32, #tpu.memory_space<vmem>>, %arg8: memref<16x1xf32, #tpu.memory_space<vmem>>, %arg9: memref<16x1xf32, #tpu.memory_space<vmem>>, %arg10: memref<2x16x128xf32, #tpu.memory_space<vmem>>, %arg11: memref<16x1xf32, #tpu.memory_space<vmem>>, %arg12: memref<16x1xf32, #tpu.memory_space<vmem>>, %arg13: memref<16x1xf32, #tpu.memory_space<vmem>>, %arg14: memref<16x1xf32, #tpu.memory_space<vmem>>, %arg15: memref<2x16x128xf32, #tpu.memory_space<vmem>>) attributes {dimension_semantics = [#tpu.dimension_semantics<parallel>, #tpu.dimension_semantics<arbitrary>, #tpu.dimension_semantics<arbitrary>, #tpu.dimension_semantics<arbitrary>], iteration_bounds = array<i64: 1, 2, 1, 1>, scalar_prefetch = 0 : i64, scratch_operands = 5 : i64, tpu.core_type = #tpu.core_type<tc>, window_params = [{transform_indices = @transform_0, window_bounds = array<i64: 2, 4, 128>}, {transform_indices = @transform_1, window_bounds = array<i64: 2, 4, 128>}, {transform_indices = @transform_2, window_bounds = array<i64: 16, 4>}, {transform_indices = @transform_3, window_bounds = array<i64: 16, 1>}, {transform_indices = @transform_4, window_bounds = array<i64: 16, 1>}, {transform_indices = @transform_5, window_bounds = array<i64: 16, 1>}, {transform_indices = @transform_6, window_bounds = array<i64: 2, 16, 128>}]} {
    %c0_i32 = arith.constant 0 : i32
    %0 = arith.cmpi eq, %arg1, %c0_i32 : i32
    %c0_i32_0 = arith.constant 0 : i32
    %1 = arith.cmpi eq, %arg2, %c0_i32_0 : i32
    %c0_i32_1 = arith.constant 0 : i32
    %2 = arith.cmpi eq, %arg3, %c0_i32_1 : i32
    %3 = arith.andi %1, %2 : i1
    %4 = arith.andi %0, %3 : i1
    %5 = arith.extui %4 : i1 to i32
    %c0_i32_2 = arith.constant 0 : i32
    %6 = arith.cmpi ne, %5, %c0_i32_2 : i32
    scf.if %6 {
      %cst = arith.constant 0.000000e+00 : f32
      %28 = vector.broadcast %cst : f32 to vector<16x1xf32>
      %c0_13 = arith.constant 0 : index
      %c0_14 = arith.constant 0 : index
      %29 = vector.load %arg11[%c0_13, %c0_14] : memref<16x1xf32, #tpu.memory_space<vmem>>, vector<16x1xf32>
      tpu.vector_store %arg11[%c0_13, %c0_14], %28 {strides = array<i32>} : memref<16x1xf32, #tpu.memory_space<vmem>>, vector<16x1xf32>,
      %cst_15 = arith.constant 0.000000e+00 : f32
      %30 = vector.broadcast %cst_15 : f32 to vector<16x1xf32>
      %c0_16 = arith.constant 0 : index
      %c0_17 = arith.constant 0 : index
      %31 = vector.load %arg12[%c0_16, %c0_17] : memref<16x1xf32, #tpu.memory_space<vmem>>, vector<16x1xf32>
      tpu.vector_store %arg12[%c0_16, %c0_17], %30 {strides = array<i32>} : memref<16x1xf32, #tpu.memory_space<vmem>>, vector<16x1xf32>,
    } else {
    }
    %c0 = arith.constant 0 : index
    %c0_3 = arith.constant 0 : index
    %7 = vector.load %arg6[%c0, %c0_3] : memref<16x4xf32, #tpu.memory_space<vmem>>, vector<16x4xf32>
    %c0_4 = arith.constant 0 : index
    %c0_5 = arith.constant 0 : index
    %8 = vector.load %arg7[%c0_4, %c0_5] : memref<16x1xf32, #tpu.memory_space<vmem>>, vector<16x1xf32>
    %9 = tpu.iota {dimensions = array<i32: 1>} : vector<1x128xi32>
    %c128_i32 = arith.constant 128 : i32
    %10 = arith.muli %arg3, %c128_i32 : i32
    %11 = vector.broadcast %10 : i32 to vector<1x128xi32>
    %12 = arith.addi %9, %11 : vector<1x128xi32>
    %c16_i32 = arith.constant 16 : i32
    %13 = vector.broadcast %c16_i32 : i32 to vector<1x128xi32>
    %14 = arith.cmpi slt, %12, %13 : vector<1x128xi32>
    %c0_i32_6 = arith.constant 0 : i32
    %15 = arith.cmpi eq, %arg1, %c0_i32_6 : i32
    %16 = arith.extui %15 : i1 to i32
    %c0_i32_7 = arith.constant 0 : i32
    %17 = arith.cmpi ne, %16, %c0_i32_7 : i32
    scf.if %17 {
      %cst = arith.constant 0.000000e+00 : f32
      %28 = vector.broadcast %cst : f32 to vector<16x1xf32>
      %cst_13 = arith.constant 0.000000e+00 : f32
      %29 = vector.broadcast %cst_13 : f32 to vector<16x1xf32>
      %c0_14 = arith.constant 0 : index
      %c0_15 = arith.constant 0 : index
      %c0_16 = arith.constant 0 : index
      %30 = vector.load %arg4[%c0_14, %c0_15, %c0_16] : memref<2x4x128xf32, #tpu.memory_space<vmem>>, vector<1x4x128xf32>
      %31 = vector.shape_cast %30 : vector<1x4x128xf32> to vector<4x128xf32>
      %c0_17 = arith.constant 0 : index
      %c0_18 = arith.constant 0 : index
      %c0_19 = arith.constant 0 : index
      %32 = vector.load %arg5[%c0_17, %c0_18, %c0_19] : memref<2x4x128xf32, #tpu.memory_space<vmem>>, vector<1x4x128xf32>
      %33 = vector.shape_cast %32 : vector<1x4x128xf32> to vector<4x128xf32>
      %34 = arith.addf %31, %33 : vector<4x128xf32>
      %cst_20 = arith.constant dense<0.000000e+00> : vector<16x128xf32>
      %35 = tpu.matmul %7, %34, %cst_20 {dimension_numbers = #tpu.dot_dimension_numbers<[1], [0], [0], [1], [0, 0, 1, 1], [], []>} : vector<16x4xf32>, vector<4x128xf32>, vector<16x128xf32> -> vector<16x128xf32>
      %36 = vector.broadcast %8 : vector<16x1xf32> to vector<16x128xf32>
      %37 = arith.addf %35, %36 : vector<16x128xf32>
      %cst_21 = arith.constant 0.000000e+00 : f32
      %38 = vector.broadcast %cst_21 : f32 to vector<16x128xf32>
      %39 = arith.maximumf %37, %38 : vector<16x128xf32>
      %40 = vector.shape_cast %39 : vector<16x128xf32> to vector<1x16x128xf32>
      %c2_i32 = arith.constant 2 : i32
      %41 = arith.muli %arg2, %c2_i32 : i32
      %c0_i32_22 = arith.constant 0 : i32
      %42 = arith.addi %41, %c0_i32_22 : i32
      %c1_i32_23 = arith.constant 1 : i32
      %43 = arith.muli %42, %c1_i32_23 : i32
      %44 = arith.addi %43, %arg3 : i32
      %45 = arith.index_cast %44 : i32 to index
      %c0_24 = arith.constant 0 : index
      %c0_25 = arith.constant 0 : index
      %46 = vector.load %arg15[%45, %c0_24, %c0_25] : memref<2x16x128xf32, #tpu.memory_space<vmem>>, vector<1x16x128xf32>
      tpu.vector_store %arg15[%45, %c0_24, %c0_25], %40 {strides = array<i32>} : memref<2x16x128xf32, #tpu.memory_space<vmem>>, vector<1x16x128xf32>,
      %cst_26 = arith.constant 0.000000e+00 : f32
      %47 = vector.shape_cast %14 : vector<1x128xi1> to vector<1x128xi1>
      %48 = vector.broadcast %47 : vector<1x128xi1> to vector<16x128xi1>
      %49 = vector.broadcast %cst_26 : f32 to vector<16x128xf32>
      %50 = arith.select %48, %39, %49 : vector<16x128xi1>, vector<16x128xf32>
      %cst_27 = arith.constant dense<0.000000e+00> : vector<16xf32>
      %51 = vector.multi_reduction <add>, %50, %cst_27 [1] : vector<16x128xf32> to vector<16xf32>
      %52 = vector.shape_cast %51 : vector<16xf32> to vector<16x1xf32>
      %53 = arith.addf %28, %52 : vector<16x1xf32>
      %54 = arith.mulf %50, %50 : vector<16x128xf32>
      %cst_28 = arith.constant dense<0.000000e+00> : vector<16xf32>
      %55 = vector.multi_reduction <add>, %54, %cst_28 [1] : vector<16x128xf32> to vector<16xf32>
      %56 = vector.shape_cast %55 : vector<16xf32> to vector<16x1xf32>
      %57 = arith.addf %29, %56 : vector<16x1xf32>
      %c1 = arith.constant 1 : index
      %c0_29 = arith.constant 0 : index
      %c0_30 = arith.constant 0 : index
      %58 = vector.load %arg4[%c1, %c0_29, %c0_30] : memref<2x4x128xf32, #tpu.memory_space<vmem>>, vector<1x4x128xf32>
      %59 = vector.shape_cast %58 : vector<1x4x128xf32> to vector<4x128xf32>
      %c1_31 = arith.constant 1 : index
      %c0_32 = arith.constant 0 : index
      %c0_33 = arith.constant 0 : index
      %60 = vector.load %arg5[%c1_31, %c0_32, %c0_33] : memref<2x4x128xf32, #tpu.memory_space<vmem>>, vector<1x4x128xf32>
      %61 = vector.shape_cast %60 : vector<1x4x128xf32> to vector<4x128xf32>
      %62 = arith.addf %59, %61 : vector<4x128xf32>
      %cst_34 = arith.constant dense<0.000000e+00> : vector<16x128xf32>
      %63 = tpu.matmul %7, %62, %cst_34 {dimension_numbers = #tpu.dot_dimension_numbers<[1], [0], [0], [1], [0, 0, 1, 1], [], []>} : vector<16x4xf32>, vector<4x128xf32>, vector<16x128xf32> -> vector<16x128xf32>
      %64 = vector.broadcast %8 : vector<16x1xf32> to vector<16x128xf32>
      %65 = arith.addf %63, %64 : vector<16x128xf32>
      %cst_35 = arith.constant 0.000000e+00 : f32
      %66 = vector.broadcast %cst_35 : f32 to vector<16x128xf32>
      %67 = arith.maximumf %65, %66 : vector<16x128xf32>
      %68 = vector.shape_cast %67 : vector<16x128xf32> to vector<1x16x128xf32>
      %c2_i32_36 = arith.constant 2 : i32
      %69 = arith.muli %arg2, %c2_i32_36 : i32
      %c1_i32_37 = arith.constant 1 : i32
      %70 = arith.addi %69, %c1_i32_37 : i32
      %c1_i32_38 = arith.constant 1 : i32
      %71 = arith.muli %70, %c1_i32_38 : i32
      %72 = arith.addi %71, %arg3 : i32
      %73 = arith.index_cast %72 : i32 to index
      %c0_39 = arith.constant 0 : index
      %c0_40 = arith.constant 0 : index
      %74 = vector.load %arg15[%73, %c0_39, %c0_40] : memref<2x16x128xf32, #tpu.memory_space<vmem>>, vector<1x16x128xf32>
      tpu.vector_store %arg15[%73, %c0_39, %c0_40], %68 {strides = array<i32>} : memref<2x16x128xf32, #tpu.memory_space<vmem>>, vector<1x16x128xf32>,
      %cst_41 = arith.constant 0.000000e+00 : f32
      %75 = vector.shape_cast %14 : vector<1x128xi1> to vector<1x128xi1>
      %76 = vector.broadcast %75 : vector<1x128xi1> to vector<16x128xi1>
      %77 = vector.broadcast %cst_41 : f32 to vector<16x128xf32>
      %78 = arith.select %76, %67, %77 : vector<16x128xi1>, vector<16x128xf32>
      %cst_42 = arith.constant dense<0.000000e+00> : vector<16xf32>
      %79 = vector.multi_reduction <add>, %78, %cst_42 [1] : vector<16x128xf32> to vector<16xf32>
      %80 = vector.shape_cast %79 : vector<16xf32> to vector<16x1xf32>
      %81 = arith.addf %53, %80 : vector<16x1xf32>
      %82 = arith.mulf %78, %78 : vector<16x128xf32>
      %cst_43 = arith.constant dense<0.000000e+00> : vector<16xf32>
      %83 = vector.multi_reduction <add>, %82, %cst_43 [1] : vector<16x128xf32> to vector<16xf32>
      %84 = vector.shape_cast %83 : vector<16xf32> to vector<16x1xf32>
      %85 = arith.addf %57, %84 : vector<16x1xf32>
      %c0_44 = arith.constant 0 : index
      %c0_45 = arith.constant 0 : index
      %86 = vector.load %arg11[%c0_44, %c0_45] : memref<16x1xf32, #tpu.memory_space<vmem>>, vector<16x1xf32>
      %87 = arith.addf %86, %81 : vector<16x1xf32>
      %c0_46 = arith.constant 0 : index
      %c0_47 = arith.constant 0 : index
      %88 = vector.load %arg11[%c0_46, %c0_47] : memref<16x1xf32, #tpu.memory_space<vmem>>, vector<16x1xf32>
      tpu.vector_store %arg11[%c0_46, %c0_47], %87 {strides = array<i32>} : memref<16x1xf32, #tpu.memory_space<vmem>>, vector<16x1xf32>,
      %c0_48 = arith.constant 0 : index
      %c0_49 = arith.constant 0 : index
      %89 = vector.load %arg12[%c0_48, %c0_49] : memref<16x1xf32, #tpu.memory_space<vmem>>, vector<16x1xf32>
      %90 = arith.addf %89, %85 : vector<16x1xf32>
      %c0_50 = arith.constant 0 : index
      %c0_51 = arith.constant 0 : index
      %91 = vector.load %arg12[%c0_50, %c0_51] : memref<16x1xf32, #tpu.memory_space<vmem>>, vector<16x1xf32>
      tpu.vector_store %arg12[%c0_50, %c0_51], %90 {strides = array<i32>} : memref<16x1xf32, #tpu.memory_space<vmem>>, vector<16x1xf32>,
    } else {
    }
    %c1_i32 = arith.constant 1 : i32
    %18 = arith.cmpi eq, %arg1, %c1_i32 : i32
    %c0_i32_8 = arith.constant 0 : i32
    %19 = arith.cmpi eq, %arg2, %c0_i32_8 : i32
    %c0_i32_9 = arith.constant 0 : i32
    %20 = arith.cmpi eq, %arg3, %c0_i32_9 : i32
    %21 = arith.andi %19, %20 : i1
    %22 = arith.andi %18, %21 : i1
    %23 = arith.extui %22 : i1 to i32
    %c0_i32_10 = arith.constant 0 : i32
    %24 = arith.cmpi ne, %23, %c0_i32_10 : i32
    scf.if %24 {
      %c0_13 = arith.constant 0 : index
      %c0_14 = arith.constant 0 : index
      %28 = vector.load %arg11[%c0_13, %c0_14] : memref<16x1xf32, #tpu.memory_space<vmem>>, vector<16x1xf32>
      %cst = arith.constant 3.125000e-02 : f32
      %29 = vector.broadcast %cst : f32 to vector<16x1xf32>
      %30 = arith.mulf %28, %29 : vector<16x1xf32>
      %c0_15 = arith.constant 0 : index
      %c0_16 = arith.constant 0 : index
      %31 = vector.load %arg12[%c0_15, %c0_16] : memref<16x1xf32, #tpu.memory_space<vmem>>, vector<16x1xf32>
      %cst_17 = arith.constant 3.125000e-02 : f32
      %32 = vector.broadcast %cst_17 : f32 to vector<16x1xf32>
      %33 = arith.mulf %31, %32 : vector<16x1xf32>
      %34 = arith.mulf %30, %30 : vector<16x1xf32>
      %35 = arith.subf %33, %34 : vector<16x1xf32>
      %cst_18 = arith.constant 0.000000e+00 : f32
      %36 = vector.broadcast %cst_18 : f32 to vector<16x1xf32>
      %37 = arith.maximumf %35, %36 : vector<16x1xf32>
      %c0_19 = arith.constant 0 : index
      %c0_20 = arith.constant 0 : index
      %38 = vector.load %arg8[%c0_19, %c0_20] : memref<16x1xf32, #tpu.memory_space<vmem>>, vector<16x1xf32>
      %cst_21 = arith.constant 9.99999974E-6 : f32
      %39 = vector.broadcast %cst_21 : f32 to vector<16x1xf32>
      %40 = arith.addf %37, %39 : vector<16x1xf32>
      %41 = math.rsqrt %40 : vector<16x1xf32>
      %42 = arith.mulf %38, %41 : vector<16x1xf32>
      %c0_22 = arith.constant 0 : index
      %c0_23 = arith.constant 0 : index
      %43 = vector.load %arg13[%c0_22, %c0_23] : memref<16x1xf32, #tpu.memory_space<vmem>>, vector<16x1xf32>
      tpu.vector_store %arg13[%c0_22, %c0_23], %42 {strides = array<i32>} : memref<16x1xf32, #tpu.memory_space<vmem>>, vector<16x1xf32>,
      %c0_24 = arith.constant 0 : index
      %c0_25 = arith.constant 0 : index
      %44 = vector.load %arg9[%c0_24, %c0_25] : memref<16x1xf32, #tpu.memory_space<vmem>>, vector<16x1xf32>
      %45 = arith.mulf %30, %42 : vector<16x1xf32>
      %46 = arith.subf %44, %45 : vector<16x1xf32>
      %c0_26 = arith.constant 0 : index
      %c0_27 = arith.constant 0 : index
      %47 = vector.load %arg14[%c0_26, %c0_27] : memref<16x1xf32, #tpu.memory_space<vmem>>, vector<16x1xf32>
      tpu.vector_store %arg14[%c0_26, %c0_27], %46 {strides = array<i32>} : memref<16x1xf32, #tpu.memory_space<vmem>>, vector<16x1xf32>,
    } else {
    }
    %c1_i32_11 = arith.constant 1 : i32
    %25 = arith.cmpi eq, %arg1, %c1_i32_11 : i32
    %26 = arith.extui %25 : i1 to i32
    %c0_i32_12 = arith.constant 0 : i32
    %27 = arith.cmpi ne, %26, %c0_i32_12 : i32
    scf.if %27 {
      %c0_13 = arith.constant 0 : index
      %c0_14 = arith.constant 0 : index
      %28 = vector.load %arg13[%c0_13, %c0_14] : memref<16x1xf32, #tpu.memory_space<vmem>>, vector<16x1xf32>
      %c0_15 = arith.constant 0 : index
      %c0_16 = arith.constant 0 : index
      %29 = vector.load %arg14[%c0_15, %c0_16] : memref<16x1xf32, #tpu.memory_space<vmem>>, vector<16x1xf32>
      %c2_i32 = arith.constant 2 : i32
      %30 = arith.muli %arg2, %c2_i32 : i32
      %c0_i32_17 = arith.constant 0 : i32
      %31 = arith.addi %30, %c0_i32_17 : i32
      %c1_i32_18 = arith.constant 1 : i32
      %32 = arith.muli %31, %c1_i32_18 : i32
      %33 = arith.addi %32, %arg3 : i32
      %34 = arith.index_cast %33 : i32 to index
      %c0_19 = arith.constant 0 : index
      %c0_20 = arith.constant 0 : index
      %35 = vector.load %arg15[%34, %c0_19, %c0_20] : memref<2x16x128xf32, #tpu.memory_space<vmem>>, vector<1x16x128xf32>
      %36 = vector.shape_cast %35 : vector<1x16x128xf32> to vector<16x128xf32>
      %37 = vector.broadcast %28 : vector<16x1xf32> to vector<16x128xf32>
      %38 = arith.mulf %36, %37 : vector<16x128xf32>
      %39 = vector.broadcast %29 : vector<16x1xf32> to vector<16x128xf32>
      %40 = arith.addf %38, %39 : vector<16x128xf32>
      %c0_21 = arith.constant 0 : index
      %c0_22 = arith.constant 0 : index
      %c0_23 = arith.constant 0 : index
      %41 = vector.load %arg10[%c0_21, %c0_22, %c0_23] : memref<2x16x128xf32, #tpu.memory_space<vmem>>, vector<1x16x128xf32>
      %42 = vector.shape_cast %41 : vector<1x16x128xf32> to vector<16x128xf32>
      %43 = vector.shape_cast %40 : vector<16x128xf32> to vector<1x16x128xf32>
      tpu.vector_store %arg10[%c0_21, %c0_22, %c0_23], %43 {strides = array<i32>} : memref<2x16x128xf32, #tpu.memory_space<vmem>>, vector<1x16x128xf32>,
      %c2_i32_24 = arith.constant 2 : i32
      %44 = arith.muli %arg2, %c2_i32_24 : i32
      %c1_i32_25 = arith.constant 1 : i32
      %45 = arith.addi %44, %c1_i32_25 : i32
      %c1_i32_26 = arith.constant 1 : i32
      %46 = arith.muli %45, %c1_i32_26 : i32
      %47 = arith.addi %46, %arg3 : i32
      %48 = arith.index_cast %47 : i32 to index
      %c0_27 = arith.constant 0 : index
      %c0_28 = arith.constant 0 : index
      %49 = vector.load %arg15[%48, %c0_27, %c0_28] : memref<2x16x128xf32, #tpu.memory_space<vmem>>, vector<1x16x128xf32>
      %50 = vector.shape_cast %49 : vector<1x16x128xf32> to vector<16x128xf32>
      %51 = vector.broadcast %28 : vector<16x1xf32> to vector<16x128xf32>
      %52 = arith.mulf %50, %51 : vector<16x128xf32>
      %53 = vector.broadcast %29 : vector<16x1xf32> to vector<16x128xf32>
      %54 = arith.addf %52, %53 : vector<16x128xf32>
      %c1 = arith.constant 1 : index
      %c0_29 = arith.constant 0 : index
      %c0_30 = arith.constant 0 : index
      %55 = vector.load %arg10[%c1, %c0_29, %c0_30] : memref<2x16x128xf32, #tpu.memory_space<vmem>>, vector<1x16x128xf32>
      %56 = vector.shape_cast %55 : vector<1x16x128xf32> to vector<16x128xf32>
      %57 = vector.shape_cast %54 : vector<16x128xf32> to vector<1x16x128xf32>
      tpu.vector_store %arg10[%c1, %c0_29, %c0_30], %57 {strides = array<i32>} : memref<2x16x128xf32, #tpu.memory_space<vmem>>, vector<1x16x128xf32>,
    } else {
    }
    return
  }
  func.func @transform_0(%arg0: i32, %arg1: i32, %arg2: i32, %arg3: i32) -> (i32, i32, i32) {
    %c1_i32 = arith.constant 1 : i32
    %0 = arith.subi %c1_i32, %arg1 : i32
    %1 = arith.muli %arg2, %0 : i32
    %c0_i32 = arith.constant 0 : i32
    %2 = arith.muli %c0_i32, %arg1 : i32
    %3 = arith.addi %1, %2 : i32
    %c1_i32_0 = arith.constant 1 : i32
    %4 = arith.subi %c1_i32_0, %arg1 : i32
    %5 = arith.muli %arg3, %4 : i32
    %c0_i32_1 = arith.constant 0 : i32
    %6 = arith.muli %c0_i32_1, %arg1 : i32
    %7 = arith.addi %5, %6 : i32
    %c0_i32_2 = arith.constant 0 : i32
    %c0_i32_3 = arith.constant 0 : i32
    return %3, %c0_i32_2, %7 : i32, i32, i32
  }
  func.func @transform_1(%arg0: i32, %arg1: i32, %arg2: i32, %arg3: i32) -> (i32, i32, i32) {
    %c1_i32 = arith.constant 1 : i32
    %0 = arith.subi %c1_i32, %arg1 : i32
    %1 = arith.muli %arg2, %0 : i32
    %c0_i32 = arith.constant 0 : i32
    %2 = arith.muli %c0_i32, %arg1 : i32
    %3 = arith.addi %1, %2 : i32
    %c1_i32_0 = arith.constant 1 : i32
    %4 = arith.subi %c1_i32_0, %arg1 : i32
    %5 = arith.muli %arg3, %4 : i32
    %c0_i32_1 = arith.constant 0 : i32
    %6 = arith.muli %c0_i32_1, %arg1 : i32
    %7 = arith.addi %5, %6 : i32
    %c0_i32_2 = arith.constant 0 : i32
    %c0_i32_3 = arith.constant 0 : i32
    return %3, %c0_i32_2, %7 : i32, i32, i32
  }
  func.func @transform_2(%arg0: i32, %arg1: i32, %arg2: i32, %arg3: i32) -> (i32, i32) {
    %c0_i32 = arith.constant 0 : i32
    %c0_i32_0 = arith.constant 0 : i32
    return %arg0, %c0_i32 : i32, i32
  }
  func.func @transform_3(%arg0: i32, %arg1: i32, %arg2: i32, %arg3: i32) -> (i32, i32) {
    %c0_i32 = arith.constant 0 : i32
    %c0_i32_0 = arith.constant 0 : i32
    return %arg0, %c0_i32 : i32, i32
  }
  func.func @transform_4(%arg0: i32, %arg1: i32, %arg2: i32, %arg3: i32) -> (i32, i32) {
    %c0_i32 = arith.constant 0 : i32
    %c0_i32_0 = arith.constant 0 : i32
    return %arg0, %c0_i32 : i32, i32
  }
  func.func @transform_5(%arg0: i32, %arg1: i32, %arg2: i32, %arg3: i32) -> (i32, i32) {
    %c0_i32 = arith.constant 0 : i32
    %c0_i32_0 = arith.constant 0 : i32
    return %arg0, %c0_i32 : i32, i32
  }
  func.func @transform_6(%arg0: i32, %arg1: i32, %arg2: i32, %arg3: i32) -> (i32, i32, i32) {
    %0 = arith.muli %arg2, %arg1 : i32
    %1 = arith.muli %arg3, %arg1 : i32
    %c0_i32 = arith.constant 0 : i32
    return %0, %arg0, %1 : i32, i32, i32
  }
}

</mosaic_0001>

<bundles_post_ra>
// kernel: tpu_custom_call.1
= control target key start
LH: loop header
LB: loop body
LE: loop exit
PB: predicated region body
PF: predicated region fallthrough
CT: control target
= control target key end

     0   :  { %11 = vsyncpa [#allocation8], 0  ;;  %s1309_s0 = inlined_call_operand.vmem [shape: f32[2,4,128], index: 0, kind: input, shape index: {}]   ;;  %s1310_s1 = inlined_call_operand.vmem [shape: f32[2,4,128], index: 1, kind: input, shape index: {}]   ;;  %s1311_s2 = inlined_call_operand.vmem [shape: f32[16,4], index: 2, kind: input, shape index: {}]   ;;  %s1312_s3 = inlined_call_operand.vmem [shape: f32[16,1], index: 3, kind: input, shape index: {}]   ;;  %s1313_s4 = inlined_call_operand.vmem [shape: f32[16,1], index: 4, kind: input, shape index: {}]   ;;  %s1314_s5 = inlined_call_operand.vmem [shape: f32[16,1], index: 5, kind: input, shape index: {}]   ;;  %s1315_s6 = inlined_call_operand.hbm [shape: f32[2,16,128], index: 6, kind: output, shape index: {}]  }
   0x1   :  { %13 = vsyncpa [#allocation8 + $0x1], 0  ;;  %s1214_s21 = smov 0   ;;  %s1216_s22 = smov 0  }
   0x2   :  { %s1218_s23 = smov 0  }
   0x3 LB: > { %s1022_s24 = sadd.s32 4294967295, %s1171_s23   ;;  %s1023_s25 = sadd.s32 4294967294, %s1171_s23   ;;  %s1171_s23 = sphi %s1218_s23, %s19_s23   ;;  %s1167_s22 = sphi %s1216_s22, %s1318_s22   ;;  %s1163_s21 = sphi %s1214_s21, %s1317_s21  }
   0x4   : > { %s41_s26 = sadd.s32 1, %s1167_s22  ;;  %p1032_p0 = scmp.ge.s32.totalorder %s1171_s23, 1 }
   0x5   : > { %p43_p1 = scmp.ge.s32.totalorder %s41_s26, 2  ;;  %p339_p2 = scmp.lt.s32.totalorder %s1171_s23, 3 }
   0x7   : > { %s1320_s26 = smov (%p43_p1, %s41_s26), 0  ;;  %p340_p3 = pnand %p1032_p0, %p339_p2 }
   0x8   : > { %p464_p4 = scmp.eq.s32.totalorder (!%p340_p3), %s1163_s21, 0 }
   0x9   : > { %343 = sbr.rel (%p340_p3) target bundleno = 589 (0x24d), region = 44 }
   0xe   : > { %472 = sbr.rel (!%p464_p4) target bundleno = 19 (0x13), region = 48  ;;  %vm473_vm0 = vcmask (%p464_p4), 7168   ;;  %v1173_v0 = vmov (%p464_p4), 0.0  }
   0xf   : > { %474 = vst.msk [vmem:[#allocation2] sm:$0xff] (%p464_p4), %vm473_vm0, %v1173_v0  ;;  %475 = vst.msk [vmem:[#allocation2 + $0x8] sm:$0xff] (%p464_p4), %vm473_vm0, %v1173_v0 }
  0x10   : > { %476 = vst.msk [vmem:[#allocation3] sm:$0xff] (%p464_p4), %vm473_vm0, %v1173_v0  ;;  %477 = vst.msk [vmem:[#allocation3 + $0x8] sm:$0xff] (%p464_p4), %vm473_vm0, %v1173_v0 }
  0x13 PF: > { %v478_v1 = vld [vmem:[%s1311_s2] sm:$0xff]  ;;  %v479_v2 = vld [vmem:[%s1311_s2 + $0x8] sm:$0xff]  ;;  %v482_v4 = vlaneseq  ;;  %p1034_p5 = scmp.ne.s32.totalorder %s1163_s21, 0 }
  0x14   : > { %v480_v3 = vld [vmem:[%s1312_s3] sm:$0xff]  ;;  %v481_v5 = vld [vmem:[%s1312_s3 + $0x8] sm:$0xff] }
  0x15   : > { %v483_v6 = vand.u32 127, %v482_v4  ;;  %490 = sbr.rel (%p1034_p5) target bundleno = 397 (0x18d), region = 52 }
  0x17   : > { %vm487_vm1 = vcmp.lt.s32.totalorder %v483_v6, 16 }
  0x1a   : > { %v491_v7 = vld [vmem:[%s1309_s0] sm:$0xf]  ;;  %vm511_vm2 = vcmask 1043456   ;;  %vm504_vm3 = vcmask 31744   ;;  %v1038_v10 = vld [vmem:[%s1309_s0 + $0x4] sm:$0xf] }
  0x1b   : > { %v492_v8 = vld [vmem:[%s1310_s1] sm:$0xf]  ;;  %v1039_v11 = vld [vmem:[%s1310_s1 + $0x4] sm:$0xf]  ;;  %1065 = vmatprep.mubr.msk.f32.mxu0 %vm504_vm3, %v478_v1  ;;  %1070 = vmatprep.mubr.msk.f32.mxu1 %vm504_vm3, %v478_v1  ;;  %v1174_v13 = vmov 0   ;;  %vm727_vm4 = vcmask 7168  }
  0x1c   : > { %v493_v9 = vadd.f32 %v492_v8, %v491_v7  ;;  %v620_v12 = vadd.f32 %v1039_v11, %v1038_v10  ;;  %1114 = vset.pattern.permute.xlu0 %v1174_v13  ;;  %v723_v39 = vld [vmem:[#allocation2] sm:$0xff]  ;;  %v724_v43 = vld [vmem:[#allocation2 + $0x8] sm:$0xff]  ;;  %v730_v48 = vld [vmem:[#allocation3] sm:$0xff] }
  0x1d   : > { %496 = vperm.xlu0 %1114, %v480_v3   ;;  %v731_v52 = vld [vmem:[#allocation3 + $0x8] sm:$0xff] }
  0x1e   : > { %1063 = vmatprep.subr.msk.mxu0 %vm511_vm2, %v493_v9  ;;  %1068 = vmatprep.subr.msk.mxu1 %vm511_vm2, %v620_v12 }
  0x1f   : > { %1064 = vmatpush3.msk.msra.mxu0 %vm511_vm2, %v493_v9  ;;  %1069 = vmatpush3.msk.msra.mxu1 %vm511_vm2, %v620_v12 }
  0x20   : > { %1066 = vmatmul.mubr.msk.f32.vlgmr.msra.gmra.mxu0 %vm504_vm3, %v479_v2  ;;  %1071 = vmatmul.mubr.msk.f32.vlgmr.msra.gmra.mxu1 %vm504_vm3, %v479_v2 }
  0x21   : > { %501 = vperm.xlu0 %1114, %v481_v5  }
  0x98   : > { %v497_v14 = vpop.permute.xlu0 %496 }
  0x9c   : > { %v502_v15 = vpop.permute.xlu0 %501 }
  0xe0   : > { %v1067_v16 = vpop.f32.mrf.mxu0  ;;  %v1072_v18 = vpop.f32.mrf.mxu1 }
  0xe1   : > { %v587_v17 = vadd.f32 %v1067_v16, %v502_v15  ;;  %v696_v19 = vadd.f32 %v1072_v18, %v502_v15 }
  0xe2   : > { %v581_v20 = vpop.f32.mrf.mxu0  ;;  %v690_v23 = vpop.f32.mrf.mxu1 }
  0xe3   : > { %v591_v21 = vmax.f32 %v587_v17, 0.0  ;;  %v582_v22 = vadd.f32 %v581_v20, %v497_v14  ;;  %v700_v24 = vmax.f32 %v696_v19, 0.0  ;;  %v691_v25 = vadd.f32 %v690_v23, %v497_v14 }
  0xe5   : > { %597 = vst [vmem:[#allocation6] sm:$0xff] %v591_v21  ;;  %v590_v26 = vmax.f32 %v582_v22, 0.0  ;;  %v601_v27 = vsel %vm487_vm1, %v591_v21, 0.0  ;;  %1044 = vst [vmem:[#allocation6 + $0x8] sm:$0xff] %v700_v24  ;;  %v699_v28 = vmax.f32 %v691_v25, 0.0  ;;  %v708_v33 = vsel %vm487_vm1, %v700_v24, 0.0 }
  0xe6   : > { %604 = vadd.xlane.f32.xlu1 %v601_v27  ;;  %v609_v31 = vmul.f32 %v601_v27, %v601_v27  ;;  %v716_v35 = vmul.f32 %v708_v33, %v708_v33 }
  0xe7   : > { %596 = vst [vmem:[#allocation6 + $0x10] sm:$0xff] %v590_v26  ;;  %v600_v29 = vsel %vm487_vm1, %v590_v26, 0.0  ;;  %1043 = vst [vmem:[#allocation6 + $0x18] sm:$0xff] %v699_v28  ;;  %v707_v32 = vsel %vm487_vm1, %v699_v28, 0.0 }
  0xe8   : > { %v608_v30 = vmul.f32 %v600_v29, %v600_v29  ;;  %v715_v34 = vmul.f32 %v707_v32, %v707_v32 }
  0xea   : > { %602 = vadd.xlane.f32.xlu1 %v600_v29  ;;  %610 = vadd.xlane.f32.xlu0 %v608_v30 }
  0xee   : > { %612 = vadd.xlane.f32.xlu1 %v609_v31 }
  0xf2   : > { %709 = vadd.xlane.f32.xlu1 %v707_v32 }
  0xf6   : > { %711 = vadd.xlane.f32.xlu1 %v708_v33 }
  0xfa   : > { %717 = vadd.xlane.f32.xlu1 %v715_v34 }
  0xfe   : > { %719 = vadd.xlane.f32.xlu1 %v716_v35 }
 0x16f   : > { %v605_v36 = vpop.xlane.xlu1 %604 }
 0x173   : > { %v603_v37 = vpop.xlane.xlu1 %602  ;;  %v611_v47 = vpop.xlane.xlu0 %610 }
 0x177   : > { %v613_v38 = vpop.xlane.xlu1 %612 }
 0x17b   : > { %v710_v40 = vpop.xlane.xlu1 %709 }
 0x17c   : > { %v713_v41 = vadd.f32 %v710_v40, %v603_v37 }
 0x17e   : > { %v725_v42 = vadd.f32 %v723_v39, %v713_v41 }
 0x17f   : > { %v712_v44 = vpop.xlane.xlu1 %711 }
 0x180   : > { %728 = vst.msk [vmem:[#allocation2] sm:$0xff] %vm727_vm4, %v725_v42  ;;  %v714_v45 = vadd.f32 %v712_v44, %v605_v36 }
 0x182   : > { %v726_v46 = vadd.f32 %v724_v43, %v714_v45 }
 0x183   : > { %v718_v49 = vpop.xlane.xlu1 %717 }
 0x184   : > { %729 = vst.msk [vmem:[#allocation2 + $0x8] sm:$0xff] %vm727_vm4, %v726_v46  ;;  %v721_v50 = vadd.f32 %v718_v49, %v611_v47 }
 0x186   : > { %v732_v51 = vadd.f32 %v730_v48, %v721_v50 }
 0x187   : > { %v720_v53 = vpop.xlane.xlu1 %719 }
 0x188   : > { %734 = vst.msk [vmem:[#allocation3] sm:$0xff] %vm727_vm4, %v732_v51  ;;  %v722_v54 = vadd.f32 %v720_v53, %v613_v38 }
 0x18a   : > { %v733_v55 = vadd.f32 %v731_v52, %v722_v54 }
 0x18c   : > { %735 = vst.msk [vmem:[#allocation3 + $0x8] sm:$0xff] %vm727_vm4, %v733_v55 }
 0x18d PF: > { %p736_p6 = scmp.eq.s32.totalorder %s1163_s21, 1 }
 0x18e   : > { %v741_v56 = vld [vmem:[#allocation2] sm:$0xff] (%p736_p6)  ;;  %v742_v60 = vld [vmem:[#allocation2 + $0x8] sm:$0xff] (%p736_p6)  ;;  %vm763_vm5 = vcmask (%p736_p6), 7168  }
 0x18f   : > { %740 = sbr.rel (!%p736_p6) target bundleno = 433 (0x1b1), region = 56  ;;  %v745_v57 = vld [vmem:[#allocation3] sm:$0xff] (%p736_p6)  ;;  %v743_v58 = vmul.f32 (%p736_p6), 0.03125, %v741_v56  ;;  %v744_v62 = vmul.f32 (%p736_p6), 0.03125, %v742_v60  ;;  %v755_v8 = vld [vmem:[%s1313_s4] sm:$0xff] (%p736_p6)  ;;  %v756_v9 = vld [vmem:[%s1313_s4 + $0x8] sm:$0xff] (%p736_p6) }
 0x190   : > { %v747_v59 = vmul.f32 (%p736_p6), 0.03125, %v745_v57  ;;  %v766_v14 = vld [vmem:[%s1314_s5] sm:$0xff] (%p736_p6)  ;;  %v767_v16 = vld [vmem:[%s1314_s5 + $0x8] sm:$0xff] (%p736_p6) }
 0x191   : > { %v749_v0 = vmul.f32 (%p736_p6), %v743_v58, %v743_v58  ;;  %v750_v1 = vmul.f32 (%p736_p6), %v744_v62, %v744_v62 }
 0x193   : > { %v746_v61 = vld [vmem:[#allocation3 + $0x8] sm:$0xff] (%p736_p6)  ;;  %v751_v2 = vsub.f32 (%p736_p6), %v747_v59, %v749_v0 }
 0x194   : > { %v748_v63 = vmul.f32 0.03125, %v746_v61 }
 0x195   : > { %v753_v4 = vmax.f32 %v751_v2, 0.0 }
 0x196   : > { %v752_v3 = vsub.f32 %v748_v63, %v750_v1 }
 0x197   : > { %v757_v6 = vadd.f32 1e-05, %v753_v4 }
 0x198   : > { %v754_v5 = vmax.f32 %v752_v3, 0.0 }
 0x199   : > { %1115 = vrsqrt.f32 %v757_v6 }
 0x19a   : > { %v758_v7 = vadd.f32 1e-05, %v754_v5 }
 0x19c   : > { %1117 = vrsqrt.f32 %v758_v7 }
 0x1a6   : > { %v1116_v10 = vpop.eup %1115 }
 0x1a7   : > { %v761_v12 = vmul.f32 %v1116_v10, %v755_v8 }
 0x1a9   : > { %v1118_v11 = vpop.eup %1117  ;;  %764 = vst.msk [vmem:[#allocation4] sm:$0xff] %vm763_vm5, %v761_v12  ;;  %v768_v15 = vmul.f32 %v761_v12, %v743_v58 }
 0x1aa   : > { %v762_v13 = vmul.f32 %v1118_v11, %v756_v9 }
 0x1ab   : > { %v770_v18 = vsub.f32 %v766_v14, %v768_v15 }
 0x1ac   : > { %765 = vst.msk [vmem:[#allocation4 + $0x8] sm:$0xff] %vm763_vm5, %v762_v13  ;;  %v769_v17 = vmul.f32 %v762_v13, %v744_v62 }
 0x1ad   : > { %772 = vst.msk [vmem:[#allocation5] sm:$0xff] %vm763_vm5, %v770_v18 }
 0x1ae   : > { %v771_v19 = vsub.f32 %v767_v16, %v769_v17 }
 0x1b0   : > { %773 = vst.msk [vmem:[#allocation5 + $0x8] sm:$0xff] %vm763_vm5, %v771_v19 }
 0x1b1 PF: > { %p1046_p7 = scmp.ne.s32.totalorder %s1163_s21, 1 }
 0x1b3   : > { %776 = sbr.rel (%p1046_p7) target bundleno = 575 (0x23f), region = 60 }
 0x1b8   : > { %v779_v20 = vld [vmem:[#allocation5] sm:$0xff]  ;;  %v777_v21 = vld [vmem:[#allocation4] sm:$0xff]  ;;  %v1175_v22 = vmov 0   ;;  %v780_v23 = vld [vmem:[#allocation5 + $0x8] sm:$0xff] }
 0x1b9   : > { %1120 = vset.pattern.permute.xlu1 %v1175_v22  ;;  %1119 = vset.pattern.permute.xlu0 %v1175_v22  ;;  %v778_v24 = vld [vmem:[#allocation4 + $0x8] sm:$0xff]  ;;  %v785_v25 = vld [vmem:[#allocation6 + $0x10] sm:$0xff]  ;;  %v1047_v26 = vld [vmem:[#allocation6 + $0x18] sm:$0xff] }
 0x1ba   : > { %801 = vperm.xlu1 %1120, %v779_v20   ;;  %789 = vperm.xlu0 %1119, %v777_v21   ;;  %v786_v31 = vld [vmem:[#allocation6] sm:$0xff]  ;;  %v1048_v32 = vld [vmem:[#allocation6 + $0x8] sm:$0xff] }
 0x1be   : > { %806 = vperm.xlu1 %1120, %v780_v23   ;;  %794 = vperm.xlu0 %1119, %v778_v24  }
 0x235   : > { %v802_v27 = vpop.permute.xlu1 %801  ;;  %v790_v28 = vpop.permute.xlu0 %789 }
 0x236   : > { %v797_v29 = vmul.f32 %v790_v28, %v785_v25  ;;  %v819_v30 = vmul.f32 %v1047_v26, %v790_v28 }
 0x238   : > { %v809_v33 = vadd.f32 %v802_v27, %v797_v29  ;;  %v821_v34 = vadd.f32 %v819_v30, %v802_v27 }
 0x239   : > { %v795_v35 = vpop.permute.xlu0 %794  ;;  %v807_v38 = vpop.permute.xlu1 %806 }
 0x23a   : > { %811 = vst [vmem:[#allocation7] sm:$0xff] %v809_v33  ;;  %1049 = vst [vmem:[#allocation7 + $0x10] sm:$0xff] %v821_v34  ;;  %v798_v36 = vmul.f32 %v795_v35, %v786_v31  ;;  %v820_v37 = vmul.f32 %v1048_v32, %v795_v35 }
 0x23c   : > { %v810_v39 = vadd.f32 %v807_v38, %v798_v36  ;;  %v822_v40 = vadd.f32 %v820_v37, %v807_v38 }
 0x23e   : > { %812 = vst [vmem:[#allocation7 + $0x8] sm:$0xff] %v810_v39  ;;  %1050 = vst [vmem:[#allocation7 + $0x18] sm:$0xff] %v822_v40 }
 0x23f PF: > { %p1286_p8 = scmp.eq.s32.totalorder %s1022_s24, 1  ;;  %s1176_s9 = smov [#allocation7]  }
 0x240   : > { %s846_s10 = sshll.u32 %s1176_s9, 4  ;;  %s847_s10 = int_to_ptr.vmem [resolvable:$true] %s846_s10 }
 0x241   : > { %s1121_s11 = scalar_lea.vmem %s847_s10, 512  ;;  %s1127_s12 = scalar_lea.vmem %s847_s10, 1024 }
 0x242   : > { %p1122_p9 = scmp.ne.s32.totalorder %s847_s10, %s1121_s11  ;;  %p1128_p12 = scmp.lt.s32.totalorder %s847_s10, %s847_s10 }
 0x243   : > { %p1129_p13 = scmp.lt.s32.totalorder %s1127_s12, %s1121_s11 }
 0x244   : > { %p1123_p10 = pnand %p1122_p9, %p1286_p8 }
 0x245   : > { %p1130_p0 = por %p1129_p13, %p1128_p12 }
 0x246   : > { %p1124_p11 = pneg %p1123_p10 }
 0x248   : > { %p1131_p1 = pnand %p1130_p0, %p1124_p11 }
 0x24a   : > { %1134 = shalt.err (!%p1131_p1)
}
 0x24b   : > { %s1177_s13 = smov 128   ;;  %s1178_s24 = smov 8  }
 0x24c   : > { %1074 = dma.vmem_to_hbm [thread:$0]  (%p1286_p8), %s847_s10, 512, %s1315_s6, [#allocation8], %s1177_s13, %s1177_s13, %s1178_s24  }
 0x24d PF: > { %p1082_p2 = scmp.ge.s32.totalorder %s1171_s23, 2  ;;  %p1083_p3 = scmp.eq.s32.totalorder %s1023_s25, 1 }
 0x24f   : > { %p1078_p4 = pnand %p1083_p3, %p1082_p2 }
 0x251   : > { %p1079_p5 = pneg %p1078_p4 }
 0x253   : > { %1158 = dma.done.wait (%p1079_p5), [#allocation8], 512  }
 0x254   : > { %1160 = vsyncadd (%p1079_p5), [#allocation8], 4294966784  ;;  %s19_s23 = sadd.s32 1, %s1171_s23   ;;  %s1317_s21 = smov %s1167_s22 }
 0x255   : > { %p16_p6 = scmp.ge.s32.totalorder %s19_s23, 4   ;;  %s1318_s22 = smov %s1320_s26 }
 0x257   :  { %18 = sbr.rel (!%p16_p6) target bundleno = 3 (0x3), region = 117 }
 0x25c   :  { %867 = vsyncpa [#allocation8], 1 }
 0x25d   :  { %869 = vsyncpa [#allocation8 + $0x1], 1 }

</bundles_post_ra>
